<compile_context>
chip_gen: v6e
topology: v6e:2x2x1
jax: 0.10.0
libtpu: 0.0.40
codegen_flags: <defaults>
</compile_context>

<pallas_src>
import numpy as np
import jax
import jax.numpy as jnp
from jax.experimental import pallas as pl
from jax.experimental.pallas import tpu as pltpu


def _balanced_counts_kernel(pred_ref, tgt_ref, out_ref, acc_tp, acc_pc, acc_tc):
    # pred_ref: (C, TP) float   tgt_ref: (1, TP) int32
    # out_ref : (C, 3) f32  -> columns [tp, pred_count, tgt_count] per channel
    # acc_*   : (C, TP) f32 lane-dense partial-sum accumulators (VMEM scratch)
    i = pl.program_id(2)

    @pl.when(i == 0)
    def _():
        acc_tp[...] = jnp.zeros_like(acc_tp)
        acc_pc[...] = jnp.zeros_like(acc_pc)
        acc_tc[...] = jnp.zeros_like(acc_tc)

    C, TP = pred_ref.shape

    # torch.nn.Softmax() over channels is monotone -> argmax is invariant, so
    # the activation is skipped (saves an EUP exp + cross-sublane max/sum + div).
    pred_cls = jnp.argmax(pred_ref[...], axis=0, keepdims=True)   # (1, TP) int32
    tgt_cls = tgt_ref[...]                                        # (1, TP) int32

    ch = jax.lax.broadcasted_iota(jnp.int32, (C, TP), 0)          # channel id per row
    pred_oh = pred_cls == ch                                      # one_hot(argmax(pred))
    tgt_oh = tgt_cls == ch                                        # one_hot(target)

    # Lane-dense accumulation: no per-step cross-lane reduce, no narrow stores.
    acc_tp[...] += (pred_oh & tgt_oh).astype(jnp.float32)
    acc_pc[...] += pred_oh.astype(jnp.float32)
    acc_tc[...] += tgt_oh.astype(jnp.float32)

    @pl.when(i == pl.num_programs(2) - 1)
    def _():
        tp = jnp.sum(acc_tp[...], axis=1, keepdims=True)          # (C, 1)
        pc = jnp.sum(acc_pc[...], axis=1, keepdims=True)
        tc = jnp.sum(acc_tc[...], axis=1, keepdims=True)
        out_ref[...] = jnp.concatenate([tp, pc, tc], axis=1)      # (C, 3), once


def balanced_loss(pred_nchw, target_nhw, w, smooth=1.0, tile_p=8192):
    """pred_nchw: (N,C,H,W) float, target_nhw: (N,H,W) int class ids."""
    N, C, H, W = pred_nchw.shape
    HW = H * W

    tile_p = min(tile_p, HW)
    assert HW % tile_p == 0, "H*W must be a multiple of the pixel tile"
    assert tile_p % 128 == 0 or tile_p == HW, "pixel tile must be lane-aligned"

    n_tiles = HW // tile_p
    # Split the pixel-tile range in two for megacore (v7x); harmless elsewhere.
    n_par = 2 if (n_tiles >= 2 and n_tiles % 2 == 0) else 1
    n_seq = n_tiles // n_par

    # Free reshapes only -- no transpose, no dtype upcast of pred.
    pred = pred_nchw.reshape(N, C, HW)
    tgt = target_nhw.reshape(N, 1, HW).astype(jnp.int32)

    counts = pl.pallas_call(
        _balanced_counts_kernel,
        out_shape=jax.ShapeDtypeStruct((N, n_par, C, 3), jnp.float32),
        grid_spec=pltpu.PrefetchScalarGridSpec(
            num_scalar_prefetch=0,
            grid=(N, n_par, n_seq),
            in_specs=[
                pl.BlockSpec((None, C, tile_p),
                             lambda n, p, i: (n, 0, p * n_seq + i)),
                pl.BlockSpec((None, 1, tile_p),
                             lambda n, p, i: (n, 0, p * n_seq + i)),
            ],
            out_specs=pl.BlockSpec((None, None, C, 3),
                                   lambda n, p, i: (n, p, 0, 0)),
            scratch_shapes=[pltpu.VMEM((C, tile_p), jnp.float32)] * 3,
        ),
        compiler_params=pltpu.CompilerParams(
            dimension_semantics=("parallel", "parallel", "arbitrary")),
    )(pred, tgt)

    counts = jnp.sum(counts, axis=(0, 1))         # (C, 3) over batch / core chunks
    tp, pred_count, tgt_count = counts[:, 0], counts[:, 1], counts[:, 2]
    fp = pred_count - tp
    fn = tgt_count - tp
    denominator = tp + fp + fn
    w = jnp.asarray(w, jnp.float32)
    return 1.0 - jnp.sum((tp + smooth) / (denominator + smooth) * w)


# TODO(synk): the `masked=True` branch (zeroing pred where sum(target, dim=1) != 1)
# is not implemented; the module default is masked=False.


def _reference_loss(pred_nchw, target_nhw, w, smooth=1.0):
    # Pure-JAX reference mirroring the torch forward (silent sanity check).
    C = pred_nchw.shape[1]
    p = jax.nn.softmax(pred_nchw, axis=1)
    pred_cls = jnp.argmax(p, axis=1)                         # (N,H,W)
    pred_oh = jax.nn.one_hot(pred_cls, C, dtype=jnp.int32)   # (N,H,W,C)
    tgt_oh = jax.nn.one_hot(target_nhw, C, dtype=jnp.int32)  # (N,H,W,C)
    tp = jnp.sum((pred_oh == 1) & (tgt_oh == 1), axis=(0, 1, 2)).astype(jnp.float32)
    fp = jnp.sum((pred_oh == 1) & (tgt_oh != 1), axis=(0, 1, 2)).astype(jnp.float32)
    fn = jnp.sum((pred_oh != 1) & (tgt_oh == 1), axis=(0, 1, 2)).astype(jnp.float32)
    den = tp + fp + fn
    return 1.0 - jnp.sum((tp + smooth) / (den + smooth) * jnp.asarray(w, jnp.float32))


if __name__ == "__main__":
    key = jax.random.PRNGKey(0)
    kp, kt = jax.random.split(key)

    N, C, H, W = 2, 4, 16, 16
    pred = jax.random.normal(kp, (N, C, H, W), dtype=jnp.float32)
    target = jax.random.randint(kt, (N, H, W), 0, C, dtype=jnp.int32)
    # Deterministic loss weights, len == outchannels.
    w = [1.0, 0.5, 0.25, 0.125]

    loss = balanced_loss(pred, target, w, smooth=1.0)
    loss = jax.block_until_ready(loss)

    ref = jax.block_until_ready(_reference_loss(pred, target, w, smooth=1.0))
    np.testing.assert_allclose(np.asarray(loss), np.asarray(ref), rtol=1e-6, atol=1e-6)

    print("KERNEL_OK")
</pallas_src>

<mosaic_0001>
module attributes {stable_mosaic.version = 11 : i64} {
  func.func @_balanced_counts_kernel(%arg0: i32, %arg1: i32, %arg2: i32, %arg3: memref<1x4x256xf32, #tpu.memory_space<vmem>>, %arg4: memref<1x1x256xi32, #tpu.memory_space<vmem>>, %arg5: memref<1x1x4x3xf32, #tpu.memory_space<vmem>>, %arg6: memref<4x256xf32, #tpu.memory_space<vmem>>, %arg7: memref<4x256xf32, #tpu.memory_space<vmem>>, %arg8: memref<4x256xf32, #tpu.memory_space<vmem>>) attributes {dimension_semantics = [#tpu.dimension_semantics<parallel>, #tpu.dimension_semantics<parallel>, #tpu.dimension_semantics<arbitrary>], iteration_bounds = array<i64: 2, 1, 1>, scalar_prefetch = 0 : i64, scratch_operands = 3 : i64, tpu.core_type = #tpu.core_type<tc>, window_params = [{transform_indices = @transform_0, window_bounds = array<i64: 1, 4, 256>}, {transform_indices = @transform_1, window_bounds = array<i64: 1, 1, 256>}, {transform_indices = @transform_2, window_bounds = array<i64: 1, 1, 4, 3>}]} {
    %c0_i32 = arith.constant 0 : i32
    %0 = arith.cmpi eq, %arg2, %c0_i32 : i32
    %1 = arith.extui %0 : i1 to i32
    %c0_i32_0 = arith.constant 0 : i32
    %2 = arith.cmpi ne, %1, %c0_i32_0 : i32
    scf.if %2 {
      %cst = arith.constant 0.000000e+00 : f32
      %33 = vector.broadcast %cst : f32 to vector<4x256xf32>
      %c0_20 = arith.constant 0 : index
      %c0_21 = arith.constant 0 : index
      %34 = vector.load %arg6[%c0_20, %c0_21] : memref<4x256xf32, #tpu.memory_space<vmem>>, vector<4x256xf32>
      tpu.vector_store %arg6[%c0_20, %c0_21], %33 {strides = array<i32>} : memref<4x256xf32, #tpu.memory_space<vmem>>, vector<4x256xf32>,
      %cst_22 = arith.constant 0.000000e+00 : f32
      %35 = vector.broadcast %cst_22 : f32 to vector<4x256xf32>
      %c0_23 = arith.constant 0 : index
      %c0_24 = arith.constant 0 : index
      %36 = vector.load %arg7[%c0_23, %c0_24] : memref<4x256xf32, #tpu.memory_space<vmem>>, vector<4x256xf32>
      tpu.vector_store %arg7[%c0_23, %c0_24], %35 {strides = array<i32>} : memref<4x256xf32, #tpu.memory_space<vmem>>, vector<4x256xf32>,
      %cst_25 = arith.constant 0.000000e+00 : f32
      %37 = vector.broadcast %cst_25 : f32 to vector<4x256xf32>
      %c0_26 = arith.constant 0 : index
      %c0_27 = arith.constant 0 : index
      %38 = vector.load %arg8[%c0_26, %c0_27] : memref<4x256xf32, #tpu.memory_space<vmem>>, vector<4x256xf32>
      tpu.vector_store %arg8[%c0_26, %c0_27], %37 {strides = array<i32>} : memref<4x256xf32, #tpu.memory_space<vmem>>, vector<4x256xf32>,
    } else {
    }
    %c0 = arith.constant 0 : index
    %c0_1 = arith.constant 0 : index
    %c0_2 = arith.constant 0 : index
    %3 = vector.load %arg3[%c0, %c0_1, %c0_2] : memref<1x4x256xf32, #tpu.memory_space<vmem>>, vector<1x4x256xf32>
    %4 = vector.shape_cast %3 : vector<1x4x256xf32> to vector<4x256xf32>
    %5 = tpu.reduce_index %4 {axis = 0 : i32, kind = #tpu.reduction_kind<arg_max>} : vector<4x256xf32> -> vector<256xi32>
    %6 = vector.shape_cast %5 : vector<256xi32> to vector<1x256xi32>
    %c0_3 = arith.constant 0 : index
    %c0_4 = arith.constant 0 : index
    %c0_5 = arith.constant 0 : index
    %7 = vector.load %arg4[%c0_3, %c0_4, %c0_5] : memref<1x1x256xi32, #tpu.memory_space<vmem>>, vector<1x1x256xi32>
    %8 = vector.shape_cast %7 : vector<1x1x256xi32> to vector<1x256xi32>
    %9 = tpu.iota {dimensions = array<i32: 0>} : vector<4x256xi32>
    %10 = vector.broadcast %6 : vector<1x256xi32> to vector<4x256xi32>
    %11 = arith.cmpi eq, %10, %9 : vector<4x256xi32>
    %12 = vector.broadcast %8 : vector<1x256xi32> to vector<4x256xi32>
    %13 = arith.cmpi eq, %12, %9 : vector<4x256xi32>
    %c0_6 = arith.constant 0 : index
    %c0_7 = arith.constant 0 : index
    %14 = vector.load %arg6[%c0_6, %c0_7] : memref<4x256xf32, #tpu.memory_space<vmem>>, vector<4x256xf32>
    %15 = arith.andi %11, %13 : vector<4x256xi1>
    %16 = arith.extui %15 : vector<4x256xi1> to vector<4x256xi32>
    %17 = arith.sitofp %16 : vector<4x256xi32> to vector<4x256xf32>
    %18 = arith.addf %14, %17 : vector<4x256xf32>
    %c0_8 = arith.constant 0 : index
    %c0_9 = arith.constant 0 : index
    %19 = vector.load %arg6[%c0_8, %c0_9] : memref<4x256xf32, #tpu.memory_space<vmem>>, vector<4x256xf32>
    tpu.vector_store %arg6[%c0_8, %c0_9], %18 {strides = array<i32>} : memref<4x256xf32, #tpu.memory_space<vmem>>, vector<4x256xf32>,
    %c0_10 = arith.constant 0 : index
    %c0_11 = arith.constant 0 : index
    %20 = vector.load %arg7[%c0_10, %c0_11] : memref<4x256xf32, #tpu.memory_space<vmem>>, vector<4x256xf32>
    %21 = arith.extui %11 : vector<4x256xi1> to vector<4x256xi32>
    %22 = arith.sitofp %21 : vector<4x256xi32> to vector<4x256xf32>
    %23 = arith.addf %20, %22 : vector<4x256xf32>
    %c0_12 = arith.constant 0 : index
    %c0_13 = arith.constant 0 : index
    %24 = vector.load %arg7[%c0_12, %c0_13] : memref<4x256xf32, #tpu.memory_space<vmem>>, vector<4x256xf32>
    tpu.vector_store %arg7[%c0_12, %c0_13], %23 {strides = array<i32>} : memref<4x256xf32, #tpu.memory_space<vmem>>, vector<4x256xf32>,
    %c0_14 = arith.constant 0 : index
    %c0_15 = arith.constant 0 : index
    %25 = vector.load %arg8[%c0_14, %c0_15] : memref<4x256xf32, #tpu.memory_space<vmem>>, vector<4x256xf32>
    %26 = arith.extui %13 : vector<4x256xi1> to vector<4x256xi32>
    %27 = arith.sitofp %26 : vector<4x256xi32> to vector<4x256xf32>
    %28 = arith.addf %25, %27 : vector<4x256xf32>
    %c0_16 = arith.constant 0 : index
    %c0_17 = arith.constant 0 : index
    %29 = vector.load %arg8[%c0_16, %c0_17] : memref<4x256xf32, #tpu.memory_space<vmem>>, vector<4x256xf32>
    tpu.vector_store %arg8[%c0_16, %c0_17], %28 {strides = array<i32>} : memref<4x256xf32, #tpu.memory_space<vmem>>, vector<4x256xf32>,
    %c0_i32_18 = arith.constant 0 : i32
    %30 = arith.cmpi eq, %arg2, %c0_i32_18 : i32
    %31 = arith.extui %30 : i1 to i32
    %c0_i32_19 = arith.constant 0 : i32
    %32 = arith.cmpi ne, %31, %c0_i32_19 : i32
    scf.if %32 {
      %c0_20 = arith.constant 0 : index
      %c0_21 = arith.constant 0 : index
      %33 = vector.load %arg6[%c0_20, %c0_21] : memref<4x256xf32, #tpu.memory_space<vmem>>, vector<4x256xf32>
      %cst = arith.constant dense<0.000000e+00> : vector<4xf32>
      %34 = vector.multi_reduction <add>, %33, %cst [1] : vector<4x256xf32> to vector<4xf32>
      %35 = vector.shape_cast %34 : vector<4xf32> to vector<4x1xf32>
      %c0_22 = arith.constant 0 : index
      %c0_23 = arith.constant 0 : index
      %36 = vector.load %arg7[%c0_22, %c0_23] : memref<4x256xf32, #tpu.memory_space<vmem>>, vector<4x256xf32>
      %cst_24 = arith.constant dense<0.000000e+00> : vector<4xf32>
      %37 = vector.multi_reduction <add>, %36, %cst_24 [1] : vector<4x256xf32> to vector<4xf32>
      %38 = vector.shape_cast %37 : vector<4xf32> to vector<4x1xf32>
      %c0_25 = arith.constant 0 : index
      %c0_26 = arith.constant 0 : index
      %39 = vector.load %arg8[%c0_25, %c0_26] : memref<4x256xf32, #tpu.memory_space<vmem>>, vector<4x256xf32>
      %cst_27 = arith.constant dense<0.000000e+00> : vector<4xf32>
      %40 = vector.multi_reduction <add>, %39, %cst_27 [1] : vector<4x256xf32> to vector<4xf32>
      %41 = vector.shape_cast %40 : vector<4xf32> to vector<4x1xf32>
      %42 = tpu.concatenate %35, %38, %41 in 1 : vector<4x1xf32>, vector<4x1xf32>, vector<4x1xf32> -> vector<4x3xf32>
      %c0_28 = arith.constant 0 : index
      %c0_29 = arith.constant 0 : index
      %c0_30 = arith.constant 0 : index
      %c0_31 = arith.constant 0 : index
      %43 = vector.load %arg5[%c0_28, %c0_29, %c0_30, %c0_31] : memref<1x1x4x3xf32, #tpu.memory_space<vmem>>, vector<1x1x4x3xf32>
      %44 = vector.shape_cast %43 : vector<1x1x4x3xf32> to vector<4x3xf32>
      %45 = vector.shape_cast %42 : vector<4x3xf32> to vector<1x1x4x3xf32>
      tpu.vector_store %arg5[%c0_28, %c0_29, %c0_30, %c0_31], %45 {strides = array<i32>} : memref<1x1x4x3xf32, #tpu.memory_space<vmem>>, vector<1x1x4x3xf32>,
    } else {
    }
    return
  }
  func.func @transform_0(%arg0: i32, %arg1: i32, %arg2: i32) -> (i32, i32, i32) {
    %c1_i32 = arith.constant 1 : i32
    %0 = arith.muli %arg1, %c1_i32 : i32
    %1 = arith.addi %0, %arg2 : i32
    %c0_i32 = arith.constant 0 : i32
    %c0_i32_0 = arith.constant 0 : i32
    return %arg0, %c0_i32, %1 : i32, i32, i32
  }
  func.func @transform_1(%arg0: i32, %arg1: i32, %arg2: i32) -> (i32, i32, i32) {
    %c1_i32 = arith.constant 1 : i32
    %0 = arith.muli %arg1, %c1_i32 : i32
    %1 = arith.addi %0, %arg2 : i32
    %c0_i32 = arith.constant 0 : i32
    %c0_i32_0 = arith.constant 0 : i32
    return %arg0, %c0_i32, %1 : i32, i32, i32
  }
  func.func @transform_2(%arg0: i32, %arg1: i32, %arg2: i32) -> (i32, i32, i32, i32) {
    %c0_i32 = arith.constant 0 : i32
    %c0_i32_0 = arith.constant 0 : i32
    %c0_i32_1 = arith.constant 0 : i32
    return %arg0, %arg1, %c0_i32, %c0_i32_0 : i32, i32, i32, i32
  }
}

</mosaic_0001>

<bundles_post_ra>
// kernel: tpu_custom_call.1
= control target key start
LH: loop header
LB: loop body
LE: loop exit
PB: predicated region body
PF: predicated region fallthrough
CT: control target
= control target key end

     0   :  { %7 = vsyncpa [#allocation6], 0  ;;  %s860_s0 = inlined_call_operand.hbm [shape: f32[2,4,256], index: 0, kind: input, shape index: {}]   ;;  %s861_s1 = inlined_call_operand.hbm [shape: s32[2,1,256], index: 1, kind: input, shape index: {}]   ;;  %s862_s2 = inlined_call_operand.vmem [shape: f32[2,1,4,3], index: 2, kind: output, shape index: {}]  }
   0x1   :  { %9 = vsyncpa [#allocation6 + $0x1], 0 }
   0x2   :  { %10 = vsyncpa [#allocation8], 0 }
   0x3   :  { %12 = vsyncpa [#allocation8 + $0x1], 0  ;;  %s714_s9 = smov 0   ;;  %s716_s10 = smov 0  }
   0x4   :  { %s718_s11 = smov 0   ;;  %s720_s12 = smov 0  }
   0x5   :  { %s722_s13 = smov 0   ;;  %s724_s14 = smov 0  }
   0x6 LB: > { %s495_s15 = sadd.s32 4294967295, %s694_s14   ;;  %s37_s16 = sadd.s32 1, %s690_s13  ;;  %s694_s14 = sphi %s724_s14, %s18_s14   ;;  %s690_s13 = sphi %s722_s13, %s873_s13   ;;  %s686_s12 = sphi %s720_s12, %s872_s12   ;;  %s682_s11 = sphi %s718_s11, %s871_s11   ;;  %s678_s10 = sphi %s716_s10, %s870_s10   ;;  %s674_s9 = sphi %s714_s9, %s869_s9  }
   0x7   : > { %p39_p0 = scmp.ge.s32.totalorder %s37_s16, 2  ;;  %s48_s17 = sadd.s32 1, %s682_s11 }
   0x8   : > { %p55_p1 = scmp.ne.s32.totalorder %s682_s11, %s678_s10  ;;  %p56_p2 = scmp.eq.s32.totalorder %s694_s14, 0 }
   0x9   : > { %s875_s16 = smov (%p39_p0, %s37_s16), 0  ;;  %p61_p4 = scmp.ne.s32.totalorder %s678_s10, %s674_s9 }
   0xa   : > { %p750_p3 = por %p56_p2, %p55_p1  ;;  %s43_s19 = ssub.s32 %s690_s13, %s875_s16 }
   0xb   : > { %p62_p5 = scmp.eq.s32.totalorder %s495_s15, 0  ;;  %p46_p6 = scmp.eq.s32.totalorder %s43_s19, 0 }
   0xc   : > { %p533_p8 = scmp.lt.s32.totalorder %s694_s14, 2  ;;  %s766_s22 = sand.u32 1, %s682_s11  }
   0xd   : > { %p757_p7 = por %p62_p5, %p61_p4  ;;  %s517_s23 = sshll.u32 %s690_s13, 7 }
   0xe   : > { %s763_s21 = scalar_select %p46_p6, %s682_s11, %s48_s17  }
   0xf   : > { %s499_s24 = sshll.u32 %s766_s22, 3  ;;  %s156_s27 = scalar_lea.hbm %s860_s0, %s517_s23 }
  0x10   : > { %s147_s28 = scalar_lea.vmem [#allocation5], %s499_s24  ;;  %p775_p9 = pnand %p533_p8, %p750_p3 }
  0x11   : > { %s158_s29 = sshll.u32 %s147_s28, 4  ;;  %p505_p10 = scmp.ge.s32.totalorder %s694_s14, 1  ;;  %s159_s29 = int_to_ptr.vmem [resolvable:$true] %s158_s29 }
  0x12   : > { %p185_p11 = scmp.lt.s32.totalorder %s694_s14, 3  ;;  %s144_s3 = scalar_lea.sflag [#allocation6], %s766_s22 }
  0x13   : > { %p586_p12 = pneg %p775_p9  ;;  %s597_s4 = scalar_lea.vmem %s159_s29, 128 }
  0x14   : > { %p598_p13 = scmp.ne.s32.totalorder %s159_s29, %s597_s4  ;;  %s696_s5 = smov [#allocation5]  }
  0x15   : > { %s602_s6 = sshll.u32 %s696_s5, 4  ;;  %s603_s6 = int_to_ptr.vmem [resolvable:$false] %s602_s6 }
  0x16   : > { %p600_p0 = pnand %p598_p13, %p586_p12  ;;  %s604_s7 = scalar_lea.vmem %s603_s6, 256 }
  0x17   : > { %p605_p2 = scmp.lt.s32.totalorder %s159_s29, %s603_s6  ;;  %p606_p3 = scmp.lt.s32.totalorder %s604_s7, %s597_s4 }
  0x18   : > { %p601_p1 = pneg %p600_p0 }
  0x19   : > { %p607_p4 = por %p606_p3, %p605_p2 }
  0x1b   : > { %p608_p5 = pnand %p607_p4, %p601_p1 }
  0x1d   : > { %611 = shalt.err (!%p608_p5)
}
  0x1e   : > { %529 = dma.hbm_to_vmem [thread:$0]  (!%p775_p9), %s156_s27, 128, %s159_s29, %s144_s3  }
  0x1f   : > { %p793_p6 = pnand %p505_p10, %p185_p11  ;;  %s502_s9 = sshll.u32 %s766_s22, 1 }
  0x20   : > { %s518_s15 = sshll.u32 %s690_s13, 5  ;;  %s169_s23 = scalar_lea.vmem [#allocation7], %s502_s9 }
  0x21   : > { %s178_s19 = scalar_lea.hbm %s861_s1, %s518_s15  ;;  %s180_s24 = sshll.u32 %s169_s23, 4  ;;  %s181_s24 = int_to_ptr.vmem [resolvable:$true] %s180_s24 }
  0x22   : > { %s166_s25 = scalar_lea.sflag [#allocation8], %s766_s22  ;;  %s625_s26 = scalar_lea.vmem %s181_s24, 32 }
  0x23   : > { %p626_p8 = scmp.ne.s32.totalorder %s181_s24, %s625_s26  ;;  %s697_s27 = smov [#allocation7]  }
  0x24   : > { %s630_s28 = sshll.u32 %s697_s27, 4  ;;  %s631_s28 = int_to_ptr.vmem [resolvable:$false] %s630_s28 }
  0x25   : > { %p628_p13 = pnand %p626_p8, %p586_p12  ;;  %s632_s29 = scalar_lea.vmem %s631_s28, 64 }
  0x26   : > { %p633_p10 = scmp.lt.s32.totalorder %s181_s24, %s631_s28  ;;  %p634_p11 = scmp.lt.s32.totalorder %s632_s29, %s625_s26 }
  0x27   : > { %p629_p0 = pneg %p628_p13 }
  0x28   : > { %p635_p1 = por %p634_p11, %p633_p10 }
  0x2a   : > { %p636_p2 = pnand %p635_p1, %p629_p0 }
  0x2c   : > { %639 = shalt.err (!%p636_p2)
}
  0x2d   : > { %532 = dma.hbm_to_vmem [thread:$0]  (!%p775_p9), %s178_s19, 32, %s181_s24, %s166_s25  }
  0x2e   : > { %189 = sbr.rel (%p793_p6) target bundleno = 227 (0xe3), region = 28  ;;  %s191_s22 = sand.u32 (!%p793_p6), 1, %s678_s10  }
  0x2f   : > { %s506_s3 = sshll.u32 (!%p793_p6), %s191_s22, 3  ;;  %s192_s4 = scalar_lea.sflag (!%p793_p6), [#allocation6], %s191_s22 }
  0x30   : > { %s195_s5 = scalar_lea.vmem (!%p793_p6), [#allocation5], %s506_s3 }
  0x33   : > { %665 = dma.done.wait (%p757_p7), %s192_s4, 128  }
  0x34   : > { %667 = vsyncadd (%p757_p7), %s192_s4, 4294967168  ;;  %s507_s6 = sshll.u32 %s191_s22, 1  ;;  %s201_s7 = scalar_lea.sflag [#allocation8], %s191_s22 }
  0x35   : > { %s204_s9 = scalar_lea.vmem [#allocation7], %s507_s6 }
  0x36   : > { %669 = dma.done.wait (%p757_p7), %s201_s7, 32  }
  0x37   : > { %671 = vsyncadd (%p757_p7), %s201_s7, 4294967264  ;;  %v254_v0 = vlaneseq  ;;  %vm256_vm0 = vcmask 1043456   ;;  %v250_v4 = vld [vmem:[%s195_s5] sm:$0xff]  ;;  %v286_v6 = vld [vmem:[%s204_s9] sm:$0x3]  ;;  %v698_v15 = vmov 0.0  }
  0x38   : > { %v252_v7 = vcombine.high %v250_v4, %v250_v4  ;;  %v257_v8 = vsel %vm256_vm0, %v250_v4, -inf  ;;  %p236_p7 = scmp.lt.s32.totalorder %s686_s12, 1  ;;  %vm372_vm13 = vcmask 7168   ;;  %vm374_vm14 = vcmask 15360  }
  0x39   : > { %v255_v1 = vshrl.u32 %v254_v0, 7  ;;  %v258_v11 = vrot.slane %v257_v8, 4  ;;  %vm376_vm15 = vcmask 19456  }
  0x3a   : > { %v272_v12 = vsel %vm256_vm0, %v252_v7, -inf  ;;  %s877_s12 = smov (!%p236_p7, %s686_s12), 1 }
  0x3b   : > { %v289_v2 = vsub.s32 0, %v255_v1  ;;  %v303_v3 = vsub.s32 1, %v255_v1  ;;  %v259_v5 = vrot.slane %v255_v1, 4  ;;  %vm260_vm3 = vcmp.ge.f32.partialorder %v257_v8, %v258_v11  ;;  %s508_s20 = sshll.u32 %s877_s12, 2 }
  0x3c   : > { %v273_v14 = vrot.slane %v272_v12, 4  ;;  %v261_v18 = vsel %vm260_vm3, %v257_v8, %v258_v11  ;;  %s242_s15 = scalar_lea.vmem %s862_s2, %s508_s20 }
  0x3d   : > { %v300_v9 = vrot.slane %v286_v6, %v289_v2  ;;  %v304_v10 = vrot.slane %v286_v6, %v303_v3  ;;  %v262_v19 = vsel %vm260_vm3, %v255_v1, %v259_v5  ;;  %v263_v22 = vrot.slane %v261_v18, 6 }
  0x3e   : > { %v264_v23 = vrot.slane %v262_v19, 6  ;;  %vm274_vm4 = vcmp.ge.f32.partialorder %v272_v12, %v273_v14 }
  0x3f   : > { %vm821_vm1 = vcmp.eq.s32.totalorder %v300_v9, %v255_v1  ;;  %vm306_vm2 = vcmp.eq.s32.totalorder %v304_v10, %v255_v1  ;;  %v275_v24 = vsel %vm274_vm4, %v272_v12, %v273_v14  ;;  %v276_v25 = vsel %vm274_vm4, %v255_v1, %v259_v5 }
  0x40   : > { %v513_v16 = vsel %vm821_vm1, 1.0, %v698_v15  ;;  %v514_v17 = vsel %vm306_vm2, 1.0, %v698_v15  ;;  %vm265_vm5 = vcmp.ge.f32.partialorder %v261_v18, %v263_v22  ;;  %v277_v28 = vrot.slane %v275_v24, 6 }
  0x41   : > { %v338_v20 = vcombine.low %v513_v16, %v514_v17  ;;  %v521_v21 = vcombine.low %v514_v17, %v514_v17  ;;  %v278_v29 = vrot.slane %v276_v25, 6  ;;  %v266_v31 = vsel %vm265_vm5, %v261_v18, %v263_v22 }
  0x42   : > { %v267_v32 = vsel %vm265_vm5, %v262_v19, %v264_v23  ;;  %v268_v33 = vrot.slane %v266_v31, 7  ;;  %vm279_vm6 = vcmp.ge.f32.partialorder %v275_v24, %v277_v28 }
  0x43   : > { %v367_v26 = vsel %vm256_vm0, %v338_v20, 0.0  ;;  %v368_v27 = vsel %vm256_vm0, %v521_v21, 0.0  ;;  %v269_v34 = vrot.slane %v267_v32, 7  ;;  %v280_v35 = vsel %vm279_vm6, %v275_v24, %v277_v28 }
  0x44   : > { %v369_v30 = vadd.f32 %v368_v27, %v367_v26  ;;  %v281_v36 = vsel %vm279_vm6, %v276_v25, %v278_v29  ;;  %vm270_vm7 = vcmp.ge.f32.partialorder %v266_v31, %v268_v33  ;;  %v282_v37 = vrot.slane %v280_v35, 7 }
  0x45   : > { %v283_v38 = vrot.slane %v281_v36, 7  ;;  %v271_v39 = vsel %vm270_vm7, %v267_v32, %v269_v34 }
  0x46   : > { %370 = vadd.xlane.f32.xlu1 %v369_v30  ;;  %vm284_vm8 = vcmp.ge.f32.partialorder %v280_v35, %v282_v37  ;;  %v290_v40 = vrot.slane %v271_v39, %v289_v2 }
  0x47   : > { %v285_v41 = vsel %vm284_vm8, %v281_v36, %v283_v38 }
  0x48   : > { %v294_v42 = vrot.slane %v285_v41, %v289_v2  ;;  %vm295_vm9 = vcmp.eq.s32.totalorder %v290_v40, %v255_v1 }
  0x49   : > { %vm308_vm10 = vmand %vm295_vm9, %vm821_vm1  ;;  %v511_v43 = vsel %vm295_vm9, 1.0, %v698_v15 }
  0x4a   : > { %vm296_vm11 = vcmp.eq.s32.totalorder %v294_v42, %v255_v1  ;;  %v509_v44 = vsel %vm308_vm10, 1.0, %v698_v15 }
  0x4b   : > { %vm309_vm12 = vmand %vm296_vm11, %vm306_vm2  ;;  %v512_v45 = vsel %vm296_vm11, 1.0, %v698_v15 }
  0x4c   : > { %v510_v46 = vsel %vm309_vm12, 1.0, %v698_v15  ;;  %v327_v47 = vcombine.low %v511_v43, %v512_v45  ;;  %v520_v48 = vcombine.low %v512_v45, %v512_v45 }
  0x4d   : > { %v316_v49 = vcombine.low %v509_v44, %v510_v46  ;;  %v519_v50 = vcombine.low %v510_v46, %v510_v46 }
  0x4e   : > { %v358_v53 = vsel %vm256_vm0, %v327_v47, 0.0  ;;  %v359_v54 = vsel %vm256_vm0, %v520_v48, 0.0 }
  0x4f   : > { %v349_v51 = vsel %vm256_vm0, %v316_v49, 0.0  ;;  %v350_v52 = vsel %vm256_vm0, %v519_v50, 0.0  ;;  %v360_v56 = vadd.f32 %v359_v54, %v358_v53 }
  0x50   : > { %v351_v55 = vadd.f32 %v350_v52, %v349_v51 }
  0x52   : > { %352 = vadd.xlane.f32.xlu0 %v351_v55 }
  0x56   : > { %361 = vadd.xlane.f32.xlu0 %v360_v56 }
  0xcf   : > { %v371_v58 = vpop.xlane.xlu1 %370 }
  0xdb   : > { %v353_v57 = vpop.xlane.xlu0 %352 }
  0xdf   : > { %v362_v59 = vpop.xlane.xlu0 %361 }
  0xe0   : > { %v373_v60 = vsel %vm372_vm13, %v353_v57, %v362_v59 }
  0xe1   : > { %v375_v61 = vsel %vm374_vm14, %v373_v60, %v371_v58 }
  0xe2   : > { %377 = vst.msk [vmem:[%s242_s15] sm:$0xf] %vm376_vm15, %v375_v61 }
  0xe3 PF: > { %s18_s14 = sadd.s32 1, %s694_s14   ;;  %s869_s9 = smov %s678_s10 }
  0xe4   : > { %p15_p9 = scmp.ge.s32.totalorder %s18_s14, 4   ;;  %s870_s10 = smov %s682_s11 }
  0xe5   : > { %s871_s11 = smov %s763_s21  ;;  %s872_s12 = smov %s690_s13 }
  0xe6   : > { %s873_s13 = smov %s875_s16  ;;  %17 = sbr.rel (!%p15_p9) target bundleno = 6 (0x6), region = 89 }
  0xeb   :  { %403 = vsyncpa [#allocation6], 1 }
  0xec   :  { %405 = vsyncpa [#allocation6 + $0x1], 1 }
  0xed   :  { %406 = vsyncpa [#allocation8], 1 }
  0xee   :  { %408 = vsyncpa [#allocation8 + $0x1], 1 }

</bundles_post_ra>
